<compile_context>
chip_gen: v6e
topology: v6e:2x2x1
jax: 0.10.0
libtpu: 0.0.40
codegen_flags: <defaults>
</compile_context>

<pallas_src>
import jax
import jax.numpy as jnp
from jax.experimental import pallas as pl
from jax.experimental.pallas import tpu as pltpu


def combine_mlp_kernel(x1_ref, x2_ref, w1a_ref, w1b_ref, b1_ref,
                       w2_ref, b2_ref, w3_ref, b3_ref, o_ref):
    """Fused Combine MLP on one batch tile.

    h1 = relu(x1@W1a + x2@W1b + b1)   # concat folded into a split matmul
    h2 = relu(h1@W2 + b2)
    o  = h2@W3 + b3                   # stored at true width / final dtype
    Dropout(p=0.1) layers are identity (eval mode).
    """
    cd = w1a_ref.dtype  # MXU compute dtype (bf16); cast rides a free VPU slot

    # Layer 1 (concat folded into two MXU matmuls, f32 accumulation).
    h1 = jnp.dot(x1_ref[...].astype(cd), w1a_ref[...],
                 preferred_element_type=jnp.float32)
    h1 = h1 + jnp.dot(x2_ref[...].astype(cd), w1b_ref[...],
                      preferred_element_type=jnp.float32)
    h1 = jnp.maximum(h1 + b1_ref[...], 0.0)          # f32 bias/ReLU epilogue
    # Dropout(p=0.1): identity in eval mode.

    # Layer 2 — only the dot inputs are cast to the MXU dtype (bf16).
    h2 = jnp.dot(h1.astype(cd), w2_ref[...],
                 preferred_element_type=jnp.float32)
    h2 = jnp.maximum(h2 + b2_ref[...], 0.0)
    # Dropout(p=0.1): identity in eval mode.

    # Layer 3 — store directly at the true output width in the final dtype.
    out = jnp.dot(h2.astype(cd), w3_ref[...],
                  preferred_element_type=jnp.float32)
    o_ref[...] = (out + b3_ref[...]).astype(o_ref.dtype)
    # Final Dropout(p=0.1): identity in eval mode.


def _round_up(v, m):
    return ((v + m - 1) // m) * m


def combine_forward(x1, x2, params, *, block_b=4096,
                    compute_dtype=jnp.bfloat16):
    """JAX wrapper mirroring Combine.forward (eval mode)."""
    w1, b1, w2, b2, w3, b3 = params
    B, in_img = x1.shape
    in_mlp = x2.shape[1]
    hidden1 = w1.shape[1]
    hidden2 = w2.shape[1]
    out_size = w3.shape[1]
    out_dtype = x1.dtype
    out_itemsize = jnp.dtype(out_dtype).itemsize

    # Fold the concat: split W1 row-wise into the x1 / x2 halves.
    # Weight casts are tiny one-time ops; keep them in the wrapper.
    cd = compute_dtype
    w1a_c = w1[:in_img].astype(cd)
    w1b_c = w1[in_img:].astype(cd)
    w2c = w2.astype(cd)
    w3c = w3.astype(cd)
    b1f = b1.reshape(1, hidden1).astype(jnp.float32)
    b2f = b2.reshape(1, hidden2).astype(jnp.float32)
    b3f = b3.reshape(1, out_size).astype(jnp.float32)

    # ---- Batch tiling -------------------------------------------------------
    # Multiple of 16 (bf16 sublane packing).  Cap so that big batches get at
    # least 2 grid steps (lets the "parallel" axis shard over v7x's two TCs).
    half_cap = _round_up(pl.cdiv(max(B, 1), 2), 16)
    tb = max(16, min(block_b, half_cap))

    # Cap the tile by a conservative per-tile VMEM budget (double-buffered
    # f32 inputs + output + f32/bf16 temps), well under the 32 MiB scoped
    # default so it is also safe on v7x (64 MiB physical / 32 MiB scoped).
    per_row_vmem = (2 * (in_img + in_mlp) * 4          # double-buffered f32 in
                    + 2 * out_size * out_itemsize      # double-buffered out
                    + 4 * (hidden1 + hidden2)          # f32 h1/h2 temps
                    + 2 * (in_img + in_mlp + hidden1 + hidden2))  # bf16 casts
    vmem_budget = 24 * 1024 * 1024
    tb_vmem_cap = max(16, (vmem_budget // max(per_row_vmem, 1)) // 16 * 16)
    tb = min(tb, tb_vmem_cap)

    Bp = _round_up(max(B, 1), tb)
    if Bp != B:
        pad = Bp - B
        x1p = jnp.pad(x1, ((0, pad), (0, 0)))
        x2p = jnp.pad(x2, ((0, pad), (0, 0)))
    else:
        x1p, x2p = x1, x2
    grid = (Bp // tb,)

    const2d = lambda i: (0, 0)  # weights/biases stay VMEM-resident across steps
    in_specs = [
        pl.BlockSpec((tb, in_img), lambda i: (i, 0)),
        pl.BlockSpec((tb, in_mlp), lambda i: (i, 0)),
        pl.BlockSpec((in_img, hidden1), const2d),
        pl.BlockSpec((in_mlp, hidden1), const2d),
        pl.BlockSpec((1, hidden1), const2d),
        pl.BlockSpec((hidden1, hidden2), const2d),
        pl.BlockSpec((1, hidden2), const2d),
        pl.BlockSpec((hidden2, out_size), const2d),
        pl.BlockSpec((1, out_size), const2d),
    ]
    # Last block dim == full array dim (out_size), so a narrow output is legal
    # and the full-row block makes the writeback DMA contiguous.
    out_specs = pl.BlockSpec((tb, out_size), lambda i: (i, 0))

    w_itemsize = jnp.dtype(cd).itemsize
    x_itemsize = jnp.dtype(x1.dtype).itemsize
    flops = 2 * Bp * (in_img * hidden1 + in_mlp * hidden1
                      + hidden1 * hidden2 + hidden2 * out_size)
    bytes_accessed = (Bp * (in_img + in_mlp) * x_itemsize            # acts in
                      + (in_img + in_mlp) * hidden1 * w_itemsize     # W1
                      + hidden1 * hidden2 * w_itemsize               # W2
                      + hidden2 * out_size * w_itemsize              # W3
                      + (hidden1 + hidden2 + out_size) * 4           # biases
                      + Bp * out_size * out_itemsize)                # out

    out = pl.pallas_call(
        combine_mlp_kernel,
        out_shape=jax.ShapeDtypeStruct((Bp, out_size), out_dtype),
        grid_spec=pltpu.PrefetchScalarGridSpec(
            num_scalar_prefetch=0,
            grid=grid,
            in_specs=in_specs,
            out_specs=out_specs,
        ),
        compiler_params=pltpu.CompilerParams(
            dimension_semantics=("parallel",)),
        cost_estimate=pl.CostEstimate(
            flops=flops, transcendentals=0, bytes_accessed=bytes_accessed),
    )(x1p, x2p, w1a_c, w1b_c, b1f, w2c, b2f, w3c, b3f)

    return out[:B] if Bp != B else out


def init_linear(key, fan_in, fan_out, dtype=jnp.float32):
    """PyTorch nn.Linear default init: U(-1/sqrt(fan_in), 1/sqrt(fan_in))."""
    kw, kb = jax.random.split(key)
    bound = 1.0 / jnp.sqrt(jnp.asarray(fan_in, dtype))
    # Stored as (in, out) so the math is x @ W (== torch's x @ W.T + b).
    w = jax.random.uniform(kw, (fan_in, fan_out), dtype, -bound, bound)
    b = jax.random.uniform(kb, (1, fan_out), dtype, -bound, bound)
    return w, b


def reference_forward(x1, x2, params, compute_dtype=jnp.float32):
    """Pure-JAX reference of the same math (dropout = identity)."""
    w1, b1, w2, b2, w3, b3 = params
    cd = compute_dtype
    x = jnp.concatenate([x1, x2], axis=1).astype(cd)
    h1 = jnp.maximum(
        jnp.dot(x, w1.astype(cd), preferred_element_type=jnp.float32) + b1, 0.0)
    h2 = jnp.maximum(
        jnp.dot(h1.astype(cd), w2.astype(cd),
                preferred_element_type=jnp.float32) + b2, 0.0)
    return jnp.dot(h2.astype(cd), w3.astype(cd),
                   preferred_element_type=jnp.float32) + b3


if __name__ == "__main__":
    key = jax.random.PRNGKey(0)
    k_x1, k_x2, k_l1, k_l2, k_l3 = jax.random.split(key, 5)

    # Small shapes consistent with the module's constructor:
    #   input_size_image=32, input_size_MLP=16, out_size=16, batch=8
    B, in_img, in_mlp, out_size = 8, 32, 16, 16
    din = in_img + in_mlp

    x1 = jax.random.normal(k_x1, (B, in_img), jnp.float32)
    x2 = jax.random.normal(k_x2, (B, in_mlp), jnp.float32)

    w1, b1 = init_linear(k_l1, din, 128)
    w2, b2 = init_linear(k_l2, 128, 32)
    w3, b3 = init_linear(k_l3, 32, out_size)
    params = (w1, b1, w2, b2, w3, b3)

    out = jax.block_until_ready(combine_forward(x1, x2, params))
    assert out.shape == (B, out_size)
    assert out.dtype == x1.dtype

    # Matched reference (same bf16 MXU inputs / f32 accumulation).
    ref_bf16 = reference_forward(x1, x2, params, compute_dtype=jnp.bfloat16)
    assert jnp.allclose(out, ref_bf16, atol=1e-2, rtol=1e-2)

    # Sanity vs. full-f32 math (looser tolerance because of bf16 MXU inputs).
    ref_f32 = reference_forward(x1, x2, params, compute_dtype=jnp.float32)
    assert jnp.allclose(out, ref_f32, atol=5e-2, rtol=5e-2)

    print("KERNEL_OK")
</pallas_src>

<mosaic_0001>
module attributes {stable_mosaic.version = 11 : i64} {
  func.func @combine_mlp_kernel(%arg0: i32, %arg1: memref<16x32xf32, #tpu.memory_space<vmem>>, %arg2: memref<16x16xf32, #tpu.memory_space<vmem>>, %arg3: memref<32x128xbf16, #tpu.memory_space<vmem>>, %arg4: memref<16x128xbf16, #tpu.memory_space<vmem>>, %arg5: memref<1x128xf32, #tpu.memory_space<vmem>>, %arg6: memref<128x32xbf16, #tpu.memory_space<vmem>>, %arg7: memref<1x32xf32, #tpu.memory_space<vmem>>, %arg8: memref<32x16xbf16, #tpu.memory_space<vmem>>, %arg9: memref<1x16xf32, #tpu.memory_space<vmem>>, %arg10: memref<16x16xf32, #tpu.memory_space<vmem>>) attributes {dimension_semantics = [#tpu.dimension_semantics<parallel>], iteration_bounds = array<i64: 1>, scalar_prefetch = 0 : i64, scratch_operands = 0 : i64, tpu.core_type = #tpu.core_type<tc>, window_params = [{transform_indices = @transform_0, window_bounds = array<i64: 16, 32>}, {transform_indices = @transform_1, window_bounds = array<i64: 16, 16>}, {pipeline_mode = #tpu.pipeline_mode<synchronous>, transform_indices = @transform_2, window_bounds = array<i64: 32, 128>}, {pipeline_mode = #tpu.pipeline_mode<synchronous>, transform_indices = @transform_3, window_bounds = array<i64: 16, 128>}, {pipeline_mode = #tpu.pipeline_mode<synchronous>, transform_indices = @transform_4, window_bounds = array<i64: 1, 128>}, {pipeline_mode = #tpu.pipeline_mode<synchronous>, transform_indices = @transform_5, window_bounds = array<i64: 128, 32>}, {pipeline_mode = #tpu.pipeline_mode<synchronous>, transform_indices = @transform_6, window_bounds = array<i64: 1, 32>}, {pipeline_mode = #tpu.pipeline_mode<synchronous>, transform_indices = @transform_7, window_bounds = array<i64: 32, 16>}, {pipeline_mode = #tpu.pipeline_mode<synchronous>, transform_indices = @transform_8, window_bounds = array<i64: 1, 16>}, {transform_indices = @transform_9, window_bounds = array<i64: 16, 16>}]} {
    %c0 = arith.constant 0 : index
    %c0_0 = arith.constant 0 : index
    %0 = vector.load %arg1[%c0, %c0_0] : memref<16x32xf32, #tpu.memory_space<vmem>>, vector<16x32xf32>
    %1 = arith.truncf %0 : vector<16x32xf32> to vector<16x32xbf16>
    %c0_1 = arith.constant 0 : index
    %c0_2 = arith.constant 0 : index
    %2 = vector.load %arg3[%c0_1, %c0_2] : memref<32x128xbf16, #tpu.memory_space<vmem>>, vector<32x128xbf16>
    %cst = arith.constant dense<0.000000e+00> : vector<16x128xf32>
    %3 = tpu.matmul %1, %2, %cst {dimension_numbers = #tpu.dot_dimension_numbers<[1], [0], [0], [1], [0, 0, 1, 1], [], []>} : vector<16x32xbf16>, vector<32x128xbf16>, vector<16x128xf32> -> vector<16x128xf32>
    %c0_3 = arith.constant 0 : index
    %c0_4 = arith.constant 0 : index
    %4 = vector.load %arg2[%c0_3, %c0_4] : memref<16x16xf32, #tpu.memory_space<vmem>>, vector<16x16xf32>
    %5 = arith.truncf %4 : vector<16x16xf32> to vector<16x16xbf16>
    %c0_5 = arith.constant 0 : index
    %c0_6 = arith.constant 0 : index
    %6 = vector.load %arg4[%c0_5, %c0_6] : memref<16x128xbf16, #tpu.memory_space<vmem>>, vector<16x128xbf16>
    %cst_7 = arith.constant dense<0.000000e+00> : vector<16x128xf32>
    %7 = tpu.matmul %5, %6, %cst_7 {dimension_numbers = #tpu.dot_dimension_numbers<[1], [0], [0], [1], [0, 0, 1, 1], [], []>} : vector<16x16xbf16>, vector<16x128xbf16>, vector<16x128xf32> -> vector<16x128xf32>
    %8 = arith.addf %3, %7 : vector<16x128xf32>
    %c0_8 = arith.constant 0 : index
    %c0_9 = arith.constant 0 : index
    %9 = vector.load %arg5[%c0_8, %c0_9] : memref<1x128xf32, #tpu.memory_space<vmem>>, vector<1x128xf32>
    %10 = vector.broadcast %9 : vector<1x128xf32> to vector<16x128xf32>
    %11 = arith.addf %8, %10 : vector<16x128xf32>
    %cst_10 = arith.constant 0.000000e+00 : f32
    %12 = vector.broadcast %cst_10 : f32 to vector<16x128xf32>
    %13 = arith.maximumf %11, %12 : vector<16x128xf32>
    %14 = arith.truncf %13 : vector<16x128xf32> to vector<16x128xbf16>
    %c0_11 = arith.constant 0 : index
    %c0_12 = arith.constant 0 : index
    %15 = vector.load %arg6[%c0_11, %c0_12] : memref<128x32xbf16, #tpu.memory_space<vmem>>, vector<128x32xbf16>
    %cst_13 = arith.constant dense<0.000000e+00> : vector<16x32xf32>
    %16 = tpu.matmul %14, %15, %cst_13 {dimension_numbers = #tpu.dot_dimension_numbers<[1], [0], [0], [1], [0, 0, 1, 1], [], []>} : vector<16x128xbf16>, vector<128x32xbf16>, vector<16x32xf32> -> vector<16x32xf32>
    %c0_14 = arith.constant 0 : index
    %c0_15 = arith.constant 0 : index
    %17 = vector.load %arg7[%c0_14, %c0_15] : memref<1x32xf32, #tpu.memory_space<vmem>>, vector<1x32xf32>
    %18 = vector.broadcast %17 : vector<1x32xf32> to vector<16x32xf32>
    %19 = arith.addf %16, %18 : vector<16x32xf32>
    %cst_16 = arith.constant 0.000000e+00 : f32
    %20 = vector.broadcast %cst_16 : f32 to vector<16x32xf32>
    %21 = arith.maximumf %19, %20 : vector<16x32xf32>
    %22 = arith.truncf %21 : vector<16x32xf32> to vector<16x32xbf16>
    %c0_17 = arith.constant 0 : index
    %c0_18 = arith.constant 0 : index
    %23 = vector.load %arg8[%c0_17, %c0_18] : memref<32x16xbf16, #tpu.memory_space<vmem>>, vector<32x16xbf16>
    %cst_19 = arith.constant dense<0.000000e+00> : vector<16x16xf32>
    %24 = tpu.matmul %22, %23, %cst_19 {dimension_numbers = #tpu.dot_dimension_numbers<[1], [0], [0], [1], [0, 0, 1, 1], [], []>} : vector<16x32xbf16>, vector<32x16xbf16>, vector<16x16xf32> -> vector<16x16xf32>
    %c0_20 = arith.constant 0 : index
    %c0_21 = arith.constant 0 : index
    %25 = vector.load %arg9[%c0_20, %c0_21] : memref<1x16xf32, #tpu.memory_space<vmem>>, vector<1x16xf32>
    %26 = vector.broadcast %25 : vector<1x16xf32> to vector<16x16xf32>
    %27 = arith.addf %24, %26 : vector<16x16xf32>
    %c0_22 = arith.constant 0 : index
    %c0_23 = arith.constant 0 : index
    %28 = vector.load %arg10[%c0_22, %c0_23] : memref<16x16xf32, #tpu.memory_space<vmem>>, vector<16x16xf32>
    tpu.vector_store %arg10[%c0_22, %c0_23], %27 {strides = array<i32>} : memref<16x16xf32, #tpu.memory_space<vmem>>, vector<16x16xf32>,
    return
  }
  func.func @transform_0(%arg0: i32) -> (i32, i32) {
    %c0_i32 = arith.constant 0 : i32
    %c0_i32_0 = arith.constant 0 : i32
    return %arg0, %c0_i32 : i32, i32
  }
  func.func @transform_1(%arg0: i32) -> (i32, i32) {
    %c0_i32 = arith.constant 0 : i32
    %c0_i32_0 = arith.constant 0 : i32
    return %arg0, %c0_i32 : i32, i32
  }
  func.func @transform_2(%arg0: i32) -> (i32, i32) {
    %c0_i32 = arith.constant 0 : i32
    %c0_i32_0 = arith.constant 0 : i32
    %c0_i32_1 = arith.constant 0 : i32
    return %c0_i32, %c0_i32_0 : i32, i32
  }
  func.func @transform_3(%arg0: i32) -> (i32, i32) {
    %c0_i32 = arith.constant 0 : i32
    %c0_i32_0 = arith.constant 0 : i32
    %c0_i32_1 = arith.constant 0 : i32
    return %c0_i32, %c0_i32_0 : i32, i32
  }
  func.func @transform_4(%arg0: i32) -> (i32, i32) {
    %c0_i32 = arith.constant 0 : i32
    %c0_i32_0 = arith.constant 0 : i32
    %c0_i32_1 = arith.constant 0 : i32
    return %c0_i32, %c0_i32_0 : i32, i32
  }
  func.func @transform_5(%arg0: i32) -> (i32, i32) {
    %c0_i32 = arith.constant 0 : i32
    %c0_i32_0 = arith.constant 0 : i32
    %c0_i32_1 = arith.constant 0 : i32
    return %c0_i32, %c0_i32_0 : i32, i32
  }
  func.func @transform_6(%arg0: i32) -> (i32, i32) {
    %c0_i32 = arith.constant 0 : i32
    %c0_i32_0 = arith.constant 0 : i32
    %c0_i32_1 = arith.constant 0 : i32
    return %c0_i32, %c0_i32_0 : i32, i32
  }
  func.func @transform_7(%arg0: i32) -> (i32, i32) {
    %c0_i32 = arith.constant 0 : i32
    %c0_i32_0 = arith.constant 0 : i32
    %c0_i32_1 = arith.constant 0 : i32
    return %c0_i32, %c0_i32_0 : i32, i32
  }
  func.func @transform_8(%arg0: i32) -> (i32, i32) {
    %c0_i32 = arith.constant 0 : i32
    %c0_i32_0 = arith.constant 0 : i32
    %c0_i32_1 = arith.constant 0 : i32
    return %c0_i32, %c0_i32_0 : i32, i32
  }
  func.func @transform_9(%arg0: i32) -> (i32, i32) {
    %c0_i32 = arith.constant 0 : i32
    %c0_i32_0 = arith.constant 0 : i32
    return %arg0, %c0_i32 : i32, i32
  }
}

</mosaic_0001>

<bundles_post_ra>
// kernel: tpu_custom_call.1
= control target key start
LH: loop header
LB: loop body
LE: loop exit
PB: predicated region body
PF: predicated region fallthrough
CT: control target
= control target key end

     0   :  { %v484_v1 = vmov 0.0   ;;  %vm485_vm0 = vmmov 0   ;;  %vm52_vm1 = vcmask 130048   ;;  %vm109_vm2 = vcmask 261120   ;;  %s628_s0 = inlined_call_operand.vmem [shape: f32[16,32], index: 0, kind: input, shape index: {}]   ;;  %s629_s1 = inlined_call_operand.vmem [shape: f32[16,16], index: 1, kind: input, shape index: {}]   ;;  %s630_s2 = inlined_call_operand.vmem [shape: bf16[32,128], index: 2, kind: input, shape index: {}]   ;;  %s631_s3 = inlined_call_operand.vmem [shape: bf16[16,128], index: 3, kind: input, shape index: {}]   ;;  %s632_s4 = inlined_call_operand.vmem [shape: f32[1,128], index: 4, kind: input, shape index: {}]   ;;  %s633_s5 = inlined_call_operand.vmem [shape: bf16[128,32], index: 5, kind: input, shape index: {}]   ;;  %s634_s6 = inlined_call_operand.vmem [shape: f32[1,32], index: 6, kind: input, shape index: {}]   ;;  %s635_s7 = inlined_call_operand.vmem [shape: bf16[32,16], index: 7, kind: input, shape index: {}]   ;;  %s636_s8 = inlined_call_operand.vmem [shape: f32[1,16], index: 8, kind: input, shape index: {}]   ;;  %s637_s9 = inlined_call_operand.hbm [shape: f32[16,16], index: 9, kind: output, shape index: {}]  }
   0x1   :  { %v449_v0 = vld [vmem:[%s631_s3] sm:$0xff]   ;;  %402 = vmatprep.subr.bf16.mxu1 %v484_v1  ;;  %v42_v3 = vld [vmem:[%s629_s1 + $0x8] sm:$0xff]  ;;  %416 = vmatprep.subr.bf16.mxu0 %v484_v1  ;;  %v452_v8 = vld [vmem:[%s633_s5 + $0x38] sm:$0xff]  }
   0x2   :  { %v41_v2 = vld [vmem:[%s629_s1] sm:$0xff]  ;;  %403 = vmatpush3.bf16.msra.mxu1 %v449_v0  ;;  %404 = vmatprep.mubr.msk.bf16.mxu1 %vm485_vm0, %v484_v1  ;;  %v450_v5 = vld [vmem:[%s630_s2 + $0x8] sm:$0xff]   ;;  %v453_v10 = vld [vmem:[%s633_s5 + $0x30] sm:$0xff]  }
   0x3   :  { %v43_v4 = vpack.c.bf16 %v42_v3, %v41_v2  ;;  %408 = vmatprep.subr.bf16.mxu1 %v484_v1  ;;  %432 = vmatprep.mubr.msk.bf16.mxu0 %vm485_vm0, %v484_v1  ;;  %v451_v6 = vld [vmem:[%s630_s2] sm:$0xff]   ;;  %v35_v9 = vld [vmem:[%s628_s0 + $0x8] sm:$0xff] }
   0x4   :  { %v34_v7 = vld [vmem:[%s628_s0] sm:$0xff]  ;;  %417 = vmatpush3.bf16.msra.mxu0 %v452_v8  ;;  %v454_v12 = vld [vmem:[%s633_s5 + $0x28] sm:$0xff]  }
   0x5   :  { %405 = vmatmul.mubr.msk.bf16.vlgmr.msra.gmra.mxu1 %vm52_vm1, %v43_v4  ;;  %418 = vmatprep.subr.bf16.mxu0 %v484_v1  ;;  %v36_v11 = vpack.c.bf16 %v35_v9, %v34_v7 }
   0x6   :  { %409 = vmatpush3.bf16.msra.mxu1 %v450_v5  ;;  %412 = vmatprep.mubr.msk.bf16.mxu1 %vm485_vm0, %v484_v1 }
   0x7   :  { %410 = vmatprep.subr.bf16.mxu1 %v484_v1 }
   0x8   :  { %419 = vmatpush3.bf16.msra.mxu0 %v453_v10 }
   0x9   :  { %420 = vmatprep.subr.bf16.mxu0 %v484_v1 }
   0xa   :  { %411 = vmatpush3.bf16.msra.mxu1 %v451_v6 }
   0xb   :  { %436 = vmatprep.subr.bf16.mxu1 %v484_v1 }
   0xc   :  { %14 = vsyncpa [#allocation3], 0  ;;  %421 = vmatpush3.bf16.msra.mxu0 %v454_v12  ;;  %v455_v13 = vld [vmem:[%s633_s5 + $0x20] sm:$0xff]   ;;  %v456_v14 = vld [vmem:[%s633_s5 + $0x18] sm:$0xff]  }
   0xd   :  { %413 = vmatmul.mubr.msk.bf16.vlgmr.msra.gmra.mxu1 %vm109_vm2, %v36_v11  ;;  %422 = vmatprep.subr.bf16.mxu0 %v484_v1  ;;  %v457_v15 = vld [vmem:[%s633_s5 + $0x10] sm:$0xff]   ;;  %v458_v16 = vld [vmem:[%s633_s5 + $0x8] sm:$0xff]   ;;  %v459_v17 = vld [vmem:[%s633_s5] sm:$0xff]  }
   0xe   :  { %440 = vmatprep.mubr.msk.bf16.mxu1 %vm485_vm0, %v484_v1  ;;  %v371_v24 = vld [vmem:[%s632_s4] ss:$0 sm:$0xff]  ;;  %v460_v34 = vld [vmem:[%s635_s7 + $0x8] sm:$0xff]  }
   0xf   :  { %437 = vmatpush3.bf16.msra.mxu1 %v460_v34  ;;  %v461_v35 = vld [vmem:[%s635_s7] sm:$0xff]   ;;  %s486_s7 = smov [#allocation2]  }
  0x10   :  { %423 = vmatpush3.bf16.msra.mxu0 %v455_v13  ;;  %438 = vmatprep.subr.bf16.mxu1 %v484_v1  ;;  %v372_v36 = vld [vmem:[%s634_s6] ss:$0 sm:$0xff]  ;;  %s355_s20 = sshll.u32 %s486_s7, 4  ;;  %s356_s20 = int_to_ptr.vmem [resolvable:$true] %s355_s20 }
  0x11   :  { %424 = vmatprep.subr.bf16.mxu0 %v484_v1  ;;  %v381_v46 = vld [vmem:[%s636_s8] ss:$0 sm:$0xff]  ;;  %s462_s6 = scalar_lea.vmem %s356_s20, 256  ;;  %p467_p1 = scmp.lt.s32.totalorder %s356_s20, %s356_s20 }
  0x12   :  { %p463_p0 = scmp.ne.s32.totalorder %s356_s20, %s462_s6  ;;  %p468_p2 = scmp.lt.s32.totalorder %s462_s6, %s462_s6 }
  0x13   :  { %439 = vmatpush3.bf16.msra.mxu1 %v461_v35 }
  0x14   :  { %425 = vmatpush3.bf16.msra.mxu0 %v456_v14  ;;  %p469_p3 = por %p468_p2, %p467_p1 }
  0x15   :  { %426 = vmatprep.subr.bf16.mxu0 %v484_v1 }
  0x16   :  { %p470_p4 = pnand %p469_p3, %p463_p0 }
  0x18   :  { %427 = vmatpush3.bf16.msra.mxu0 %v457_v15 }
  0x19   :  { %428 = vmatprep.subr.bf16.mxu0 %v484_v1 }
  0x1c   :  { %429 = vmatpush3.bf16.msra.mxu0 %v458_v16 }
  0x1d   :  { %430 = vmatprep.subr.bf16.mxu0 %v484_v1 }
  0x20   :  { %431 = vmatpush3.bf16.msra.mxu0 %v459_v17 }
  0xc5   :  { %v90_v18 = vpop.f32.mrf.mxu1 }
  0xc7   :  { %v406_v19 = vpop.f32.mrf.mxu1 }
  0xc9   :  { %v93_v20 = vpop.f32.mrf.mxu1 }
  0xcb   :  { %v407_v21 = vpop.f32.mrf.mxu1 }
  0xcd   :  { %v147_v22 = vpop.f32.mrf.mxu1 }
  0xce   :  { %v148_v23 = vadd.f32 %v147_v22, %v90_v18 }
  0xcf   :  { %v414_v25 = vpop.f32.mrf.mxu1 }
  0xd0   :  { %v161_v27 = vadd.f32 %v371_v24, %v148_v23 }
  0xd1   :  { %v150_v26 = vpop.f32.mrf.mxu1 }
  0xd2   :  { %v151_v28 = vadd.f32 %v150_v26, %v93_v20  ;;  %v163_v31 = vmax.f32 %v161_v27, 0.0 }
  0xd3   :  { %v415_v29 = vpop.f32.mrf.mxu1 }
  0xd4   :  { %v162_v30 = vadd.f32 %v371_v24, %v151_v28 }
  0xd6   :  { %v164_v32 = vmax.f32 %v162_v30, 0.0 }
  0xd8   :  { %v165_v33 = vpack.c.bf16 %v164_v32, %v163_v31 }
  0xda   :  { %433 = vmatmul.mubr.bf16.vlgmr.msra.gmra.mxu0 %v165_v33 }
 0x19a   :  { %v271_v37 = vpop.f32.mrf.mxu0 }
 0x19b   :  { %v272_v39 = vadd.f32 %v372_v36, %v271_v37 }
 0x19c   :  { %v434_v38 = vpop.f32.mrf.mxu0 }
 0x19d   :  { %v278_v43 = vmax.f32 %v272_v39, 0.0 }
 0x19e   :  { %v274_v40 = vpop.f32.mrf.mxu0 }
 0x19f   :  { %v275_v41 = vadd.f32 %v372_v36, %v274_v40 }
 0x1a0   :  { %v435_v42 = vpop.f32.mrf.mxu0 }
 0x1a1   :  { %v279_v44 = vmax.f32 %v275_v41, 0.0 }
 0x1a3   :  { %v280_v45 = vpack.c.bf16 %v279_v44, %v278_v43 }
 0x1a5   :  { %441 = vmatmul.mubr.msk.bf16.vlgmr.msra.gmra.mxu1 %vm109_vm2, %v280_v45 }
 0x265   :  { %v341_v47 = vpop.f32.mrf.mxu1 }
 0x266   :  { %v342_v48 = vadd.f32 %v381_v46, %v341_v47 }
 0x267   :  { %v442_v49 = vpop.f32.mrf.mxu1 }
 0x268   :  { %348 = vst.msk [vmem:[#allocation2] sm:$0xff] %vm52_vm1, %v342_v48 }
 0x269   :  { %v344_v50 = vpop.f32.mrf.mxu1 }
 0x26a   :  { %v345_v51 = vadd.f32 %v381_v46, %v344_v50 }
 0x26b   :  { %v443_v52 = vpop.f32.mrf.mxu1 }
 0x26c   :  { %349 = vst.msk [vmem:[#allocation2 + $0x8] sm:$0xff] %vm52_vm1, %v345_v51 }
 0x26d   :  { %473 = shalt.err (!%p470_p4)
}
 0x26e   :  { %s487_s8 = smov 128   ;;  %s488_s21 = smov 8  }
 0x26f   :  { %361 = dma.vmem_to_hbm [thread:$0]  %s356_s20, 256, %s637_s9, [#allocation3], %s487_s8, %s487_s8, %s488_s21  }
 0x270   :  { %482 = dma.done.wait [#allocation3], 256  }
 0x271   :  { %483 = vsyncadd [#allocation3], 4294967040 }
 0x272   :  { %365 = vsyncpa [#allocation3], 1 }

</bundles_post_ra>
